<compile_context>
chip_gen: v6e
topology: v6e:2x2x1
jax: 0.10.0
libtpu: 0.0.40
codegen_flags: <defaults>
</compile_context>

<pallas_src>
import functools

import jax
import jax.numpy as jnp
import numpy as np
from jax.experimental import pallas as pl
from jax.experimental.pallas import tpu as pltpu

LN_EPS = 1e-5

_MAX_BATCH_TILE = 256    # MXU rows per step (2 passes on v5e 128^2, 1 on v6e/v7x 256^2)
_MAX_CLASS_TILE = 1024   # bounds the resident W_head tile for very large heads (v7x VMEM)


def _round_up(x, m):
    return ((x + m - 1) // m) * m


def _pad_lanes(n):
    """Pad a feature dim to 128 lanes; 256-align anything larger (v6e/v7x MXU is 2x256^2)."""
    p = _round_up(n, 128)
    if p > 128:
        p = _round_up(p, 256)
    return p


def _vit_wrapper_kernel(x_ref, w_patch_ref, b_patch_ref, gamma_ref, beta_ref,
                        mask_ref, w_head_ref, b_head_ref, out_ref, y_ref,
                        *, d_real, apply_mask):
    # x_ref      : (Bt, P_pad)    bf16  pooled patch features (mean over tokens)
    # w_patch_ref: (P_pad, D_pad) bf16
    # b_patch/gamma/beta/mask    : (1, D_pad) f32 (mask = 1 on real-D lanes, 0 on pads)
    # w_head_ref : (D_pad, Ct)    bf16,  b_head_ref: (1, Ct) f32
    # out_ref    : (Bt, Ct)       f32
    # y_ref      : (Bt, D_pad)    bf16  VMEM scratch: cached LayerNorm output

    # Pooled embedding + LayerNorm depend only on the batch tile -> compute once
    # per batch tile (inner class-tile index 0) and cache in VMEM scratch.
    @pl.when(pl.program_id(1) == 0)
    def _():
        # synthetic vit (linear patch embedding) fused with the token mean
        pooled = jnp.dot(x_ref[...], w_patch_ref[...],
                         preferred_element_type=jnp.float32)        # (Bt, D_pad) f32
        pooled = pooled + b_patch_ref[...]                          # pad cols stay 0

        # mlp_head[0]: LayerNorm over the real D lanes (biased var, eps=1e-5)
        inv_d = jnp.float32(1.0 / d_real)
        if apply_mask:                                  # static check: only when D < D_pad
            pooled = pooled * mask_ref[...]             # defensively zero pad lanes
        mu = jnp.sum(pooled, axis=-1, keepdims=True) * inv_d        # (Bt, 1)
        diff = pooled - mu
        if apply_mask:
            diff = diff * mask_ref[...]                 # keep pad lanes out of the variance
        var = jnp.sum(diff * diff, axis=-1, keepdims=True) * inv_d  # (Bt, 1)
        xhat = diff * jax.lax.rsqrt(var + LN_EPS)       # rsqrt rides the EUP slot
        y = xhat * gamma_ref[...] + beta_ref[...]       # pad lanes -> 0 (gamma/beta pads 0)
        y_ref[...] = y.astype(y_ref.dtype)              # cache bf16 for the head matmul

    # mlp_head[1]: Linear(dim, num_classes) -- one class tile per inner grid step
    logits = jnp.dot(y_ref[...], w_head_ref[...],
                     preferred_element_type=jnp.float32)            # (Bt, Ct) f32
    out_ref[...] = (logits + b_head_ref[...]).astype(out_ref.dtype)


def prepare_params(params, *, patch, in_channels):
    """One-time pad/cast of the weights into TPU-friendly padded bf16/f32 layouts.

    Runs outside the per-call hot path so the forward never re-reads/re-pads the
    f32 weights from HBM on every call.
    """
    w_patch, b_patch, gamma, beta, w_head, b_head = params
    P, D = w_patch.shape
    num_classes = w_head.shape[1]
    assert P == in_channels * patch * patch, "W_patch rows must equal C*patch*patch"

    P_pad = _pad_lanes(P)
    D_pad = _pad_lanes(D)
    C_pad = _pad_lanes(num_classes)
    if C_pad > _MAX_CLASS_TILE:
        C_pad = _round_up(C_pad, _MAX_CLASS_TILE)   # class tiles divide C_pad exactly

    w_patch_p = jnp.pad(w_patch, ((0, P_pad - P), (0, D_pad - D))).astype(jnp.bfloat16)
    b_patch_p = jnp.pad(b_patch, ((0, 0), (0, D_pad - D))).astype(jnp.float32)
    gamma_p = jnp.pad(gamma, ((0, 0), (0, D_pad - D))).astype(jnp.float32)
    beta_p = jnp.pad(beta, ((0, 0), (0, D_pad - D))).astype(jnp.float32)
    # Precomputed LayerNorm lane mask -- replaces per-grid-step iota+compare+cast.
    mask_p = (jnp.arange(D_pad, dtype=jnp.int32)[None, :] < D).astype(jnp.float32)
    w_head_p = jnp.pad(w_head, ((0, D_pad - D), (0, C_pad - num_classes))).astype(jnp.bfloat16)
    b_head_p = jnp.pad(b_head, ((0, 0), (0, C_pad - num_classes))).astype(jnp.float32)

    padded = (w_patch_p, b_patch_p, gamma_p, beta_p, mask_p, w_head_p, b_head_p)
    return jax.device_put(padded)


@functools.partial(jax.jit, static_argnames=("patch", "dim", "num_classes"))
def vit_wrapper_forward(img, padded_params, *, patch, dim, num_classes):
    """img: (B, C, H, W) float32 (NCHW). Returns logits (B, num_classes) float32."""
    B, C, H, W = img.shape
    if H % patch or W % patch:
        raise ValueError("H and W must be divisible by `patch`")
    nh, nw = H // patch, W // patch
    P = C * patch * patch

    (w_patch_p, b_patch_p, gamma_p, beta_p, mask_p, w_head_p, b_head_p) = padded_params
    P_pad, D_pad = w_patch_p.shape
    C_pad = w_head_p.shape[1]

    # ---- token mean, commuted in front of the (linear) patch embedding ---------
    # This single read of `img` is the dominant HBM traffic of the whole forward.
    # Left to XLA as one fused reshape+reduce, restructured so the heavy first
    # pass reduces the nh patch-grid axis over sublanes with the full W row
    # lane-contiguous; the second pass runs on an nh-times smaller tensor.
    # Feature order of the pooled vector is (C, ph, pw), matching W_patch rows.
    # TODO(synk): fold the strided pooling into the Pallas kernel (batch-tiled
    # BlockSpec on img) once a lane-split-free in-kernel formulation is available.
    x = img.astype(jnp.float32).reshape(B, C, nh, patch, W).mean(axis=2)   # (B,C,ph,W)
    pooled_patches = x.reshape(B, C, patch, nw, patch).mean(axis=3)        # (B,C,ph,pw)
    pooled_patches = pooled_patches.reshape(B, P)

    # ---- tiling -----------------------------------------------------------------
    Bt = min(_round_up(B, 8), _MAX_BATCH_TILE)     # 8..256 MXU rows per grid step
    B_pad = _round_up(B, Bt)
    Ct = C_pad if C_pad <= _MAX_CLASS_TILE else _MAX_CLASS_TILE
    grid = (B_pad // Bt, C_pad // Ct)              # class axis innermost ("arbitrary")

    x_p = jnp.pad(pooled_patches, ((0, B_pad - B), (0, P_pad - P))).astype(jnp.bfloat16)

    # VMEM budget: double-buffered blocks (Pallas default) + LN scratch + margin.
    block_bytes = (
        Bt * P_pad * 2 + P_pad * D_pad * 2             # pooled patches, W_patch
        + 4 * 8 * D_pad * 4                            # b_patch/gamma/beta/mask (sublane-padded)
        + D_pad * Ct * 2 + 8 * Ct * 4                  # W_head class tile, b_head tile
        + Bt * Ct * 4                                  # output tile
    )
    vmem_limit = 2 * block_bytes + Bt * D_pad * 2 + (4 << 20)
    vmem_limit = int(min(max(vmem_limit, 32 << 20), 64 << 20))

    kernel = functools.partial(_vit_wrapper_kernel, d_real=dim,
                               apply_mask=(dim != D_pad))

    out = pl.pallas_call(
        kernel,
        # f32 output keeps full head precision; switch to bf16 if downstream
        # consumers accept it (halves writeback; Ct stays a 128-multiple either way).
        out_shape=jax.ShapeDtypeStruct((B_pad, C_pad), jnp.float32),
        grid=grid,
        in_specs=[
            pl.BlockSpec((Bt, P_pad), lambda i, j: (i, 0)),      # pooled patch features
            pl.BlockSpec((P_pad, D_pad), lambda i, j: (0, 0)),   # W_patch (resident)
            pl.BlockSpec((1, D_pad), lambda i, j: (0, 0)),       # b_patch
            pl.BlockSpec((1, D_pad), lambda i, j: (0, 0)),       # gamma
            pl.BlockSpec((1, D_pad), lambda i, j: (0, 0)),       # beta
            pl.BlockSpec((1, D_pad), lambda i, j: (0, 0)),       # LN lane mask
            pl.BlockSpec((D_pad, Ct), lambda i, j: (0, j)),      # W_head class tile
            pl.BlockSpec((1, Ct), lambda i, j: (0, j)),          # b_head class tile
        ],
        out_specs=pl.BlockSpec((Bt, Ct), lambda i, j: (i, j)),
        scratch_shapes=[pltpu.VMEM((Bt, D_pad), jnp.bfloat16)],  # cached LayerNorm output
        compiler_params=pltpu.CompilerParams(
            dimension_semantics=("parallel", "arbitrary"),
            vmem_limit_bytes=vmem_limit),
    )(x_p, w_patch_p, b_patch_p, gamma_p, beta_p, mask_p, w_head_p, b_head_p)
    return out[:B, :num_classes]


def _reference_forward(img, params, *, patch):
    """Pure-JAX f32 reference matching the PyTorch semantics (per-token path)."""
    B, C, H, W = img.shape
    nh, nw = H // patch, W // patch
    x = img.reshape(B, C, nh, patch, nw, patch)
    x = jnp.transpose(x, (0, 2, 4, 1, 3, 5)).reshape(B, nh * nw, C * patch * patch)
    w_patch, b_patch, gamma, beta, w_head, b_head = params
    tokens = x @ w_patch + b_patch                        # (B, N, D)  == vit(img)
    pooled = tokens.mean(axis=1)                          # (B, D)     == x.mean(dim=1)
    mu = pooled.mean(-1, keepdims=True)
    var = ((pooled - mu) ** 2).mean(-1, keepdims=True)
    y = (pooled - mu) / jnp.sqrt(var + LN_EPS) * gamma + beta
    return y @ w_head + b_head


def init_params(key, C, patch, dim, num_classes):
    P = C * patch * patch
    k1, k2, k3, k4 = jax.random.split(key, 4)
    w_patch = jax.random.normal(k1, (P, dim), jnp.float32) * (1.0 / np.sqrt(P))
    b_patch = jax.random.normal(k2, (1, dim), jnp.float32) * 0.02
    gamma = jnp.ones((1, dim), jnp.float32)                 # LayerNorm weight init
    beta = jnp.zeros((1, dim), jnp.float32)                 # LayerNorm bias init
    w_head = jax.random.normal(k3, (dim, num_classes), jnp.float32) * (1.0 / np.sqrt(dim))
    b_head = jax.random.normal(k4, (1, num_classes), jnp.float32) * 0.02
    return (w_patch, b_patch, gamma, beta, w_head, b_head)


if __name__ == "__main__":
    B, C, H, W = 2, 4, 16, 16
    patch = 4
    dim = 32
    num_classes = 8

    key = jax.random.PRNGKey(0)
    k_img, k_param = jax.random.split(key)
    img = jax.random.normal(k_img, (B, C, H, W), jnp.float32)
    params = init_params(k_param, C, patch, dim, num_classes)

    # One-time weight pad/cast (kept out of the per-call hot path).
    padded = prepare_params(params, patch=patch, in_channels=C)

    out = vit_wrapper_forward(img, padded, patch=patch, dim=dim, num_classes=num_classes)
    out = jax.block_until_ready(out)

    ref = _reference_forward(img, params, patch=patch)
    assert out.shape == (B, num_classes)
    # bf16 matmul operands (f32 accumulation) -> looser tolerance than pure f32.
    np.testing.assert_allclose(np.asarray(out), np.asarray(ref), rtol=3e-2, atol=3e-2)
    print("KERNEL_OK")
</pallas_src>

<mosaic_0001>
module attributes {stable_mosaic.version = 11 : i64} {
  func.func @_vit_wrapper_kernel(%arg0: i32, %arg1: i32, %arg2: memref<8x128xbf16, #tpu.memory_space<vmem>>, %arg3: memref<128x128xbf16, #tpu.memory_space<vmem>>, %arg4: memref<1x128xf32, #tpu.memory_space<vmem>>, %arg5: memref<1x128xf32, #tpu.memory_space<vmem>>, %arg6: memref<1x128xf32, #tpu.memory_space<vmem>>, %arg7: memref<1x128xf32, #tpu.memory_space<vmem>>, %arg8: memref<128x128xbf16, #tpu.memory_space<vmem>>, %arg9: memref<1x128xf32, #tpu.memory_space<vmem>>, %arg10: memref<8x128xf32, #tpu.memory_space<vmem>>, %arg11: memref<8x128xbf16, #tpu.memory_space<vmem>>) attributes {dimension_semantics = [#tpu.dimension_semantics<parallel>, #tpu.dimension_semantics<arbitrary>], iteration_bounds = array<i64: 1, 1>, scalar_prefetch = 0 : i64, scratch_operands = 1 : i64, tpu.core_type = #tpu.core_type<tc>, window_params = [{transform_indices = @transform_0, window_bounds = array<i64: 8, 128>}, {pipeline_mode = #tpu.pipeline_mode<synchronous>, transform_indices = @transform_1, window_bounds = array<i64: 128, 128>}, {pipeline_mode = #tpu.pipeline_mode<synchronous>, transform_indices = @transform_2, window_bounds = array<i64: 1, 128>}, {pipeline_mode = #tpu.pipeline_mode<synchronous>, transform_indices = @transform_3, window_bounds = array<i64: 1, 128>}, {pipeline_mode = #tpu.pipeline_mode<synchronous>, transform_indices = @transform_4, window_bounds = array<i64: 1, 128>}, {pipeline_mode = #tpu.pipeline_mode<synchronous>, transform_indices = @transform_5, window_bounds = array<i64: 1, 128>}, {transform_indices = @transform_6, window_bounds = array<i64: 128, 128>}, {transform_indices = @transform_7, window_bounds = array<i64: 1, 128>}, {transform_indices = @transform_8, window_bounds = array<i64: 8, 128>}]} {
    %c0_i32 = arith.constant 0 : i32
    %0 = arith.cmpi eq, %arg1, %c0_i32 : i32
    %1 = arith.extui %0 : i1 to i32
    %c0_i32_0 = arith.constant 0 : i32
    %2 = arith.cmpi ne, %1, %c0_i32_0 : i32
    scf.if %2 {
      %c0_8 = arith.constant 0 : index
      %c0_9 = arith.constant 0 : index
      %10 = vector.load %arg2[%c0_8, %c0_9] : memref<8x128xbf16, #tpu.memory_space<vmem>>, vector<8x128xbf16>
      %c0_10 = arith.constant 0 : index
      %c0_11 = arith.constant 0 : index
      %11 = vector.load %arg3[%c0_10, %c0_11] : memref<128x128xbf16, #tpu.memory_space<vmem>>, vector<128x128xbf16>
      %cst_12 = arith.constant dense<0.000000e+00> : vector<8x128xf32>
      %12 = tpu.matmul %10, %11, %cst_12 {dimension_numbers = #tpu.dot_dimension_numbers<[1], [0], [0], [1], [0, 0, 1, 1], [], []>} : vector<8x128xbf16>, vector<128x128xbf16>, vector<8x128xf32> -> vector<8x128xf32>
      %c0_13 = arith.constant 0 : index
      %c0_14 = arith.constant 0 : index
      %13 = vector.load %arg4[%c0_13, %c0_14] : memref<1x128xf32, #tpu.memory_space<vmem>>, vector<1x128xf32>
      %14 = vector.broadcast %13 : vector<1x128xf32> to vector<8x128xf32>
      %15 = arith.addf %12, %14 : vector<8x128xf32>
      %c0_15 = arith.constant 0 : index
      %c0_16 = arith.constant 0 : index
      %16 = vector.load %arg7[%c0_15, %c0_16] : memref<1x128xf32, #tpu.memory_space<vmem>>, vector<1x128xf32>
      %17 = vector.broadcast %16 : vector<1x128xf32> to vector<8x128xf32>
      %18 = arith.mulf %15, %17 : vector<8x128xf32>
      %cst_17 = arith.constant dense<0.000000e+00> : vector<8xf32>
      %19 = vector.multi_reduction <add>, %18, %cst_17 [1] : vector<8x128xf32> to vector<8xf32>
      %20 = vector.shape_cast %19 : vector<8xf32> to vector<8x1xf32>
      %cst_18 = arith.constant 3.125000e-02 : f32
      %21 = vector.broadcast %cst_18 : f32 to vector<8x1xf32>
      %22 = arith.mulf %20, %21 : vector<8x1xf32>
      %23 = vector.broadcast %22 : vector<8x1xf32> to vector<8x128xf32>
      %24 = arith.subf %18, %23 : vector<8x128xf32>
      %c0_19 = arith.constant 0 : index
      %c0_20 = arith.constant 0 : index
      %25 = vector.load %arg7[%c0_19, %c0_20] : memref<1x128xf32, #tpu.memory_space<vmem>>, vector<1x128xf32>
      %26 = vector.broadcast %25 : vector<1x128xf32> to vector<8x128xf32>
      %27 = arith.mulf %24, %26 : vector<8x128xf32>
      %28 = arith.mulf %27, %27 : vector<8x128xf32>
      %cst_21 = arith.constant dense<0.000000e+00> : vector<8xf32>
      %29 = vector.multi_reduction <add>, %28, %cst_21 [1] : vector<8x128xf32> to vector<8xf32>
      %30 = vector.shape_cast %29 : vector<8xf32> to vector<8x1xf32>
      %cst_22 = arith.constant 3.125000e-02 : f32
      %31 = vector.broadcast %cst_22 : f32 to vector<8x1xf32>
      %32 = arith.mulf %30, %31 : vector<8x1xf32>
      %cst_23 = arith.constant 9.99999974E-6 : f32
      %33 = vector.broadcast %cst_23 : f32 to vector<8x1xf32>
      %34 = arith.addf %32, %33 : vector<8x1xf32>
      %35 = math.rsqrt %34 : vector<8x1xf32>
      %36 = vector.broadcast %35 : vector<8x1xf32> to vector<8x128xf32>
      %37 = arith.mulf %27, %36 : vector<8x128xf32>
      %c0_24 = arith.constant 0 : index
      %c0_25 = arith.constant 0 : index
      %38 = vector.load %arg5[%c0_24, %c0_25] : memref<1x128xf32, #tpu.memory_space<vmem>>, vector<1x128xf32>
      %39 = vector.broadcast %38 : vector<1x128xf32> to vector<8x128xf32>
      %40 = arith.mulf %37, %39 : vector<8x128xf32>
      %c0_26 = arith.constant 0 : index
      %c0_27 = arith.constant 0 : index
      %41 = vector.load %arg6[%c0_26, %c0_27] : memref<1x128xf32, #tpu.memory_space<vmem>>, vector<1x128xf32>
      %42 = vector.broadcast %41 : vector<1x128xf32> to vector<8x128xf32>
      %43 = arith.addf %40, %42 : vector<8x128xf32>
      %44 = arith.truncf %43 : vector<8x128xf32> to vector<8x128xbf16>
      %c0_28 = arith.constant 0 : index
      %c0_29 = arith.constant 0 : index
      %45 = vector.load %arg11[%c0_28, %c0_29] : memref<8x128xbf16, #tpu.memory_space<vmem>>, vector<8x128xbf16>
      tpu.vector_store %arg11[%c0_28, %c0_29], %44 {strides = array<i32>} : memref<8x128xbf16, #tpu.memory_space<vmem>>, vector<8x128xbf16>,
    } else {
    }
    %c0 = arith.constant 0 : index
    %c0_1 = arith.constant 0 : index
    %3 = vector.load %arg11[%c0, %c0_1] : memref<8x128xbf16, #tpu.memory_space<vmem>>, vector<8x128xbf16>
    %c0_2 = arith.constant 0 : index
    %c0_3 = arith.constant 0 : index
    %4 = vector.load %arg8[%c0_2, %c0_3] : memref<128x128xbf16, #tpu.memory_space<vmem>>, vector<128x128xbf16>
    %cst = arith.constant dense<0.000000e+00> : vector<8x128xf32>
    %5 = tpu.matmul %3, %4, %cst {dimension_numbers = #tpu.dot_dimension_numbers<[1], [0], [0], [1], [0, 0, 1, 1], [], []>} : vector<8x128xbf16>, vector<128x128xbf16>, vector<8x128xf32> -> vector<8x128xf32>
    %c0_4 = arith.constant 0 : index
    %c0_5 = arith.constant 0 : index
    %6 = vector.load %arg9[%c0_4, %c0_5] : memref<1x128xf32, #tpu.memory_space<vmem>>, vector<1x128xf32>
    %7 = vector.broadcast %6 : vector<1x128xf32> to vector<8x128xf32>
    %8 = arith.addf %5, %7 : vector<8x128xf32>
    %c0_6 = arith.constant 0 : index
    %c0_7 = arith.constant 0 : index
    %9 = vector.load %arg10[%c0_6, %c0_7] : memref<8x128xf32, #tpu.memory_space<vmem>>, vector<8x128xf32>
    tpu.vector_store %arg10[%c0_6, %c0_7], %8 {strides = array<i32>} : memref<8x128xf32, #tpu.memory_space<vmem>>, vector<8x128xf32>,
    return
  }
  func.func @transform_0(%arg0: i32, %arg1: i32) -> (i32, i32) {
    %c0_i32 = arith.constant 0 : i32
    %c0_i32_0 = arith.constant 0 : i32
    return %arg0, %c0_i32 : i32, i32
  }
  func.func @transform_1(%arg0: i32, %arg1: i32) -> (i32, i32) {
    %c0_i32 = arith.constant 0 : i32
    %c0_i32_0 = arith.constant 0 : i32
    %c0_i32_1 = arith.constant 0 : i32
    return %c0_i32, %c0_i32_0 : i32, i32
  }
  func.func @transform_2(%arg0: i32, %arg1: i32) -> (i32, i32) {
    %c0_i32 = arith.constant 0 : i32
    %c0_i32_0 = arith.constant 0 : i32
    %c0_i32_1 = arith.constant 0 : i32
    return %c0_i32, %c0_i32_0 : i32, i32
  }
  func.func @transform_3(%arg0: i32, %arg1: i32) -> (i32, i32) {
    %c0_i32 = arith.constant 0 : i32
    %c0_i32_0 = arith.constant 0 : i32
    %c0_i32_1 = arith.constant 0 : i32
    return %c0_i32, %c0_i32_0 : i32, i32
  }
  func.func @transform_4(%arg0: i32, %arg1: i32) -> (i32, i32) {
    %c0_i32 = arith.constant 0 : i32
    %c0_i32_0 = arith.constant 0 : i32
    %c0_i32_1 = arith.constant 0 : i32
    return %c0_i32, %c0_i32_0 : i32, i32
  }
  func.func @transform_5(%arg0: i32, %arg1: i32) -> (i32, i32) {
    %c0_i32 = arith.constant 0 : i32
    %c0_i32_0 = arith.constant 0 : i32
    %c0_i32_1 = arith.constant 0 : i32
    return %c0_i32, %c0_i32_0 : i32, i32
  }
  func.func @transform_6(%arg0: i32, %arg1: i32) -> (i32, i32) {
    %c0_i32 = arith.constant 0 : i32
    %c0_i32_0 = arith.constant 0 : i32
    return %c0_i32, %arg1 : i32, i32
  }
  func.func @transform_7(%arg0: i32, %arg1: i32) -> (i32, i32) {
    %c0_i32 = arith.constant 0 : i32
    %c0_i32_0 = arith.constant 0 : i32
    return %c0_i32, %arg1 : i32, i32
  }
  func.func @transform_8(%arg0: i32, %arg1: i32) -> (i32, i32) {
    %c0_i32 = arith.constant 0 : i32
    return %arg0, %arg1 : i32, i32
  }
}

</mosaic_0001>

<bundles_post_ra>
// kernel: vit_wrapper_forward.1
= control target key start
LH: loop header
LB: loop body
LE: loop exit
PB: predicated region body
PF: predicated region fallthrough
CT: control target
= control target key end

     0   :  { %v400_v0 = vmov 0.0   ;;  %vm401_vm0 = vmmov 0   ;;  %s534_s1 = inlined_call_operand.vmem [shape: bf16[128,128], index: 1, kind: input, shape index: {}]   ;;  %s535_s0 = inlined_call_operand.vmem [shape: bf16[8,128], index: 0, kind: input, shape index: {}]   ;;  %s536_s2 = inlined_call_operand.vmem [shape: f32[1,128], index: 2, kind: input, shape index: {}]   ;;  %s537_s5 = inlined_call_operand.vmem [shape: f32[1,128], index: 5, kind: input, shape index: {}]   ;;  %s538_s6 = inlined_call_operand.vmem [shape: bf16[128,128], index: 6, kind: input, shape index: {}]   ;;  %s539_s3 = inlined_call_operand.vmem [shape: f32[1,128], index: 3, kind: input, shape index: {}]   ;;  %s540_s4 = inlined_call_operand.vmem [shape: f32[1,128], index: 4, kind: input, shape index: {}]   ;;  %s541_s7 = inlined_call_operand.vmem [shape: f32[1,128], index: 7, kind: input, shape index: {}]   ;;  %s542_s8 = inlined_call_operand.vmem [shape: f32[8,128], index: 8, kind: output, shape index: {}]  }
   0x1   :  { %340 = vmatprep.subr.bf16.mxu0 %v400_v0  ;;  %v382_v1 = vld [vmem:[%s534_s1 + $0x38] sm:$0xff]   ;;  %356 = vmatprep.mubr.msk.bf16.mxu0 %vm401_vm0, %v400_v0  ;;  %v383_v2 = vld [vmem:[%s534_s1 + $0x30] sm:$0xff]   ;;  %v384_v3 = vld [vmem:[%s534_s1 + $0x28] sm:$0xff]  }
   0x2   :  { %360 = vmatprep.subr.bf16.mxu1 %v400_v0  ;;  %376 = vmatprep.mubr.msk.bf16.mxu1 %vm401_vm0, %v400_v0  ;;  %v385_v4 = vld [vmem:[%s534_s1 + $0x20] sm:$0xff]   ;;  %v386_v5 = vld [vmem:[%s534_s1 + $0x18] sm:$0xff]   ;;  %v387_v6 = vld [vmem:[%s534_s1 + $0x10] sm:$0xff]  }
   0x3   :  { %341 = vmatpush3.bf16.msra.mxu0 %v382_v1  ;;  %v388_v7 = vld [vmem:[%s534_s1 + $0x8] sm:$0xff]   ;;  %v389_v8 = vld [vmem:[%s534_s1] sm:$0xff]   ;;  %v390_v23 = vld [vmem:[%s538_s6 + $0x38] sm:$0xff]  }
   0x4   :  { %342 = vmatprep.subr.bf16.mxu0 %v400_v0  ;;  %v34_v9 = vld [vmem:[%s535_s0] sm:$0xf]  ;;  %361 = vmatpush3.bf16.msra.mxu1 %v390_v23  ;;  %v391_v24 = vld [vmem:[%s538_s6 + $0x30] sm:$0xff]   ;;  %v392_v25 = vld [vmem:[%s538_s6 + $0x28] sm:$0xff]  }
   0x5   :  { %v301_v10 = vld [vmem:[%s536_s2] ss:$0 sm:$0xff]  ;;  %362 = vmatprep.subr.bf16.mxu1 %v400_v0  ;;  %v394_v27 = vld [vmem:[%s538_s6 + $0x18] sm:$0xff]   ;;  %v395_v28 = vld [vmem:[%s538_s6 + $0x10] sm:$0xff]  }
   0x6   :  { %v310_v12 = vld [vmem:[%s537_s5] ss:$0 sm:$0xff]  ;;  %v396_v29 = vld [vmem:[%s538_s6 + $0x8] sm:$0xff]  }
   0x7   :  { %343 = vmatpush3.bf16.msra.mxu0 %v383_v2  ;;  %v393_v26 = vld [vmem:[%s538_s6 + $0x20] sm:$0xff]  }
   0x8   :  { %344 = vmatprep.subr.bf16.mxu0 %v400_v0  ;;  %363 = vmatpush3.bf16.msra.mxu1 %v391_v24  ;;  %v397_v30 = vld [vmem:[%s538_s6] sm:$0xff]  }
   0x9   :  { %364 = vmatprep.subr.bf16.mxu1 %v400_v0  ;;  %v311_v35 = vld [vmem:[%s539_s3] ss:$0 sm:$0xff] }
   0xa   :  { %v312_v37 = vld [vmem:[%s540_s4] ss:$0 sm:$0xff] }
   0xb   :  { %345 = vmatpush3.bf16.msra.mxu0 %v384_v3  ;;  %v313_v42 = vld [vmem:[%s541_s7] ss:$0 sm:$0xff] }
   0xc   :  { %346 = vmatprep.subr.bf16.mxu0 %v400_v0  ;;  %365 = vmatpush3.bf16.msra.mxu1 %v392_v25 }
   0xd   :  { %366 = vmatprep.subr.bf16.mxu1 %v400_v0 }
   0xf   :  { %347 = vmatpush3.bf16.msra.mxu0 %v385_v4 }
  0x10   :  { %348 = vmatprep.subr.bf16.mxu0 %v400_v0  ;;  %367 = vmatpush3.bf16.msra.mxu1 %v393_v26 }
  0x11   :  { %368 = vmatprep.subr.bf16.mxu1 %v400_v0 }
  0x13   :  { %349 = vmatpush3.bf16.msra.mxu0 %v386_v5 }
  0x14   :  { %350 = vmatprep.subr.bf16.mxu0 %v400_v0  ;;  %369 = vmatpush3.bf16.msra.mxu1 %v394_v27 }
  0x15   :  { %370 = vmatprep.subr.bf16.mxu1 %v400_v0 }
  0x17   :  { %351 = vmatpush3.bf16.msra.mxu0 %v387_v6 }
  0x18   :  { %352 = vmatprep.subr.bf16.mxu0 %v400_v0  ;;  %371 = vmatpush3.bf16.msra.mxu1 %v395_v28 }
  0x19   :  { %372 = vmatprep.subr.bf16.mxu1 %v400_v0 }
  0x1b   :  { %353 = vmatpush3.bf16.msra.mxu0 %v388_v7 }
  0x1c   :  { %354 = vmatprep.subr.bf16.mxu0 %v400_v0  ;;  %373 = vmatpush3.bf16.msra.mxu1 %v396_v29 }
  0x1d   :  { %374 = vmatprep.subr.bf16.mxu1 %v400_v0 }
  0x1f   :  { %355 = vmatpush3.bf16.msra.mxu0 %v389_v8 }
  0x20   :  { %375 = vmatpush3.bf16.msra.mxu1 %v397_v30 }
  0x22   :  { %357 = vmatmul.mubr.bf16.vlgmr.msra.gmra.mxu0 %v34_v9 }
  0xe2   :  { %v140_v11 = vpop.f32.mrf.mxu0 }
  0xe3   :  { %v141_v13 = vadd.f32 %v301_v10, %v140_v11 }
  0xe4   :  { %v358_v14 = vpop.f32.mrf.mxu0 }
  0xe5   :  { %v153_v15 = vmul.f32 %v310_v12, %v141_v13 }
  0xe6   :  { %v143_v16 = vpop.f32.mrf.mxu0 }
  0xe7   :  { %154 = vadd.xlane.f32.xlu0 %v153_v15 }
  0xe8   :  { %v359_v17 = vpop.f32.mrf.mxu0 }
 0x170   :  { %v155_v18 = vpop.xlane.xlu0 %154 }
 0x171   :  { %v156_v19 = vmul.f32 0.03125, %v155_v18 }
 0x173   :  { %v157_v20 = vsub.f32 %v153_v15, %v156_v19 }
 0x175   :  { %v158_v21 = vmul.f32 %v310_v12, %v157_v20 }
 0x177   :  { %v159_v22 = vmul.f32 %v158_v21, %v158_v21 }
 0x179   :  { %160 = vadd.xlane.f32.xlu0 %v159_v22 }
 0x202   :  { %v161_v31 = vpop.xlane.xlu0 %160 }
 0x203   :  { %v162_v32 = vmul.f32 0.03125, %v161_v31 }
 0x205   :  { %v163_v33 = vadd.f32 1e-05, %v162_v32 }
 0x207   :  { %398 = vrsqrt.f32 %v163_v33 }
 0x214   :  { %v399_v34 = vpop.eup %398 }
 0x215   :  { %v165_v36 = vmul.f32 %v399_v34, %v158_v21 }
 0x217   :  { %v173_v38 = vmul.f32 %v311_v35, %v165_v36 }
 0x219   :  { %v181_v39 = vadd.f32 %v312_v37, %v173_v38 }
 0x21b   :  { %v182_v40 = vpack.c.bf16 %v181_v39, %v181_v39 }
 0x21d   :  { %183 = vst [vmem:[#allocation2] sm:$0xf] %v182_v40 }
 0x224   :  { %v184_v41 = vld [vmem:[#allocation2] sm:$0xf] }
 0x225   :  { %377 = vmatmul.mubr.bf16.vlgmr.msra.gmra.mxu1 %v184_v41 }
 0x2e5   :  { %v290_v43 = vpop.f32.mrf.mxu1 }
 0x2e6   :  { %v291_v44 = vadd.f32 %v313_v42, %v290_v43 }
 0x2e7   :  { %v378_v45 = vpop.f32.mrf.mxu1 }
 0x2e8   :  { %296 = vst [vmem:[%s542_s8] sm:$0xff] %v291_v44 }
 0x2e9   :  { %v293_v46 = vpop.f32.mrf.mxu1 }
 0x2eb   :  { %v379_v47 = vpop.f32.mrf.mxu1 }

</bundles_post_ra>
